<compile_context>
chip_gen: v6e
topology: v6e:2x2x1
jax: 0.10.0
libtpu: 0.0.40
codegen_flags: <defaults>
</compile_context>

<pallas_src>
import functools

import jax
import jax.numpy as jnp
from jax.experimental import pallas as pl
from jax.experimental.pallas import tpu as pltpu


def _ctg_kernel(x_ref, ablk_ref, w_ref, badd_ref, o_ref, *, aggregate_first):
    """One (time-tile, sample-group) grid step.

    x_ref    : (1, B*C_in,  L)       L = Tt*Vp lanes (multiple of 128), compute dtype
    ablk_ref : (1, L, L)             per-time-tile block-diagonal adjacency, compute dtype
    w_ref    : (B*C_out, B*C_in)     block-diagonal 1x1-conv weight over the B merged samples
    badd_ref : (B*C_out, L)          precomputed post-aggregation bias  b[co]*sum_v A[t,v,w], f32
    o_ref    : (1, B*C_out, L)
    """
    x = x_ref[0]                      # (B*C_in, L)
    ablk = ablk_ref[0]                # (L, L)
    w = w_ref[...]                    # (B*C_out, B*C_in)

    if aggregate_first:
        # Cheaper when C_in <= C_out: the big (., L) x (L, L) contraction uses C_in rows.
        z = jnp.dot(x, ablk, preferred_element_type=jnp.float32)            # (B*C_in, L)
        y = jnp.dot(w, z.astype(w.dtype), preferred_element_type=jnp.float32)
    else:
        h = jnp.dot(w, x, preferred_element_type=jnp.float32)               # (B*C_out, L)
        y = jnp.dot(h.astype(ablk.dtype), ablk, preferred_element_type=jnp.float32)

    # Bias is added after aggregation: (W x + b) @ A == (W x) @ A + b * colsum(A).
    o_ref[0] = (y + badd_ref[...]).astype(o_ref.dtype)


def conv_temporal_graphical(x, A, W, b, kernel_size, *,
                            compute_dtype=jnp.bfloat16,
                            samples_per_step=4,
                            lane_tile_target=1024):
    """Pallas TPU implementation of ConvTemporalGraphical.forward (default temporal params).

    x : (N, C_in, T, V)
    A : (K, V, V) with K == kernel_size (and K == T, required by the module's einsum)
    W : (C_out, C_in, 1, 1) conv weight (or (C_out, C_in)),  b : (C_out,) conv bias
    returns (N, C_out, T, V) in x.dtype
    """
    N, Cin, T, V = x.shape
    K = A.shape[0]
    assert K == kernel_size, (A.shape, kernel_size)
    assert K == T, "einsum 'nctv,tvw->nctw' requires A.shape[0] == T"
    if W.ndim == 4:
        assert W.shape[2] == 1 and W.shape[3] == 1, \
            "TODO(synk): t_kernel_size > 1 temporal conv not implemented"
        w2 = W.reshape(W.shape[0], W.shape[1])
    else:
        w2 = W
    Cout = w2.shape[0]
    out_dtype = x.dtype

    # ---------------- tiling choices -----------------------------------------------------
    # Pad V so a whole number of timesteps fills each 128-lane group -> lane-dense blocks.
    if V >= 128:
        Vp = ((V + 127) // 128) * 128
        tpb = 1                                   # timesteps per 128-lane group
    else:
        Vp = 1 << (V - 1).bit_length()            # next power of two (divides 128)
        tpb = 128 // Vp
    unit = tpb * Vp                               # lanes per group (multiple of 128)
    lane_blocks_needed = -(-T // tpb)
    blocks_per_tile = max(1, min(lane_blocks_needed, max(1, lane_tile_target // unit)))
    Tt = tpb * blocks_per_tile                    # timesteps per grid step
    Tp = -(-T // Tt) * Tt                         # zero-padded T
    G = Tp // Tt                                  # number of time tiles
    L = Tt * Vp                                   # lanes per block (multiple of 128)

    B = max(1, min(N, samples_per_step))          # samples merged per grid step
    Np = -(-N // B) * B                           # zero-padded N

    # ---------------- operand preparation (wrapper-side; padding is numerically inert) ----
    # x: pad, cast, and merge B samples into the channel axis (metadata-only reshapes).
    x_pad = jnp.pad(x, ((0, Np - N), (0, 0), (0, Tp - T), (0, Vp - V)))
    x_r = x_pad.astype(compute_dtype).reshape(Np // B, B * Cin, Tp * Vp)

    # Per-time-tile block-diagonal adjacency:
    #   ablk[g, t*Vp+v, s*Vp+w] = A[g*Tt+t, v, w] * (t == s); padded rows/cols are zero.
    A_pad = jnp.pad(A, ((0, Tp - T), (0, Vp - V), (0, Vp - V)))
    eye_t = jnp.eye(Tt, dtype=A_pad.dtype)
    ablk = (A_pad.reshape(G, Tt, Vp, Vp)[:, :, :, None, :]
            * eye_t[None, :, None, :, None]).reshape(G, L, L).astype(compute_dtype)

    # Block-diagonal conv weight over the B merged samples -> one 2-D matmul per step.
    eye_b = jnp.eye(B, dtype=w2.dtype)
    w_bd = (eye_b[:, None, :, None] * w2[None, :, None, :]) \
        .reshape(B * Cout, B * Cin).astype(compute_dtype)

    # Post-aggregation bias term (exact in f32): badd[co, (t,w)] = b[co] * sum_v A[t,v,w].
    asum = jnp.pad(A.sum(axis=1), ((0, Tp - T), (0, Vp - V)))           # (Tp, Vp)
    badd = b.astype(jnp.float32)[:, None] * asum.astype(jnp.float32).reshape(1, Tp * Vp)
    badd_r = jnp.tile(badd, (B, 1))                                     # (B*Cout, Tp*Vp)

    aggregate_first = Cin <= Cout

    # ---------------- VMEM budget / compiler params --------------------------------------
    cb = jnp.dtype(compute_dtype).itemsize
    ob = jnp.dtype(out_dtype).itemsize
    blk_bytes = (B * Cin * L * cb          # x block
                 + L * L * cb              # A tile
                 + B * Cout * L * 4        # bias block (f32)
                 + B * Cout * L * ob)      # output block
    blk_bytes = 2 * blk_bytes + 2 * (B * Cout) * (B * Cin) * cb   # double buffers + weight
    vmem_limit = int(min(64 << 20, max(16 << 20, 4 * blk_bytes)))  # headroom for f32 temps

    kernel = functools.partial(_ctg_kernel, aggregate_first=aggregate_first)

    out = pl.pallas_call(
        kernel,
        out_shape=jax.ShapeDtypeStruct((Np // B, B * Cout, Tp * Vp), out_dtype),
        grid_spec=pltpu.PrefetchScalarGridSpec(
            num_scalar_prefetch=0,
            # Time tiles outer, sample groups inner: the A / bias block indices are constant
            # across the inner axis, so they are not re-DMA'd per sample group.
            grid=(G, Np // B),
            in_specs=[
                pl.BlockSpec((1, B * Cin, L), lambda t, n: (n, 0, t)),
                pl.BlockSpec((1, L, L), lambda t, n: (t, 0, 0)),
                # Grid-invariant and tiny; default double-buffering costs a few KiB only,
                # so no explicit single-buffering (pl.Buffered) is needed.
                pl.BlockSpec((B * Cout, B * Cin), lambda t, n: (0, 0)),
                pl.BlockSpec((B * Cout, L), lambda t, n: (0, t)),
            ],
            out_specs=pl.BlockSpec((1, B * Cout, L), lambda t, n: (n, 0, t)),
        ),
        compiler_params=pltpu.CompilerParams(
            dimension_semantics=("parallel", "parallel"),
            vmem_limit_bytes=vmem_limit,
        ),
    )(x_r, ablk, w_bd, badd_r)

    # Undo the wrapper-side merges (metadata reshape) and crop the zero padding.
    return out.reshape(Np, Cout, Tp, Vp)[:N, :, :T, :V]


def _reference(x, A, W, b):
    """Pure-JAX f32 reference of the module's forward pass."""
    Cout = W.shape[0]
    h = jnp.einsum("oi,nitv->notv", W.reshape(Cout, -1), x) + b[None, :, None, None]
    return jnp.einsum("nctv,tvw->nctw", h, A)


if __name__ == "__main__":
    # Small deterministic example consistent with the module's shapes.
    N, Cin, Cout, T, V = 2, 4, 8, 8, 16
    kernel_size = T  # the forward's einsum 'nctv,tvw->nctw' requires A.shape[0] == T

    key = jax.random.PRNGKey(0)
    kx, ka, kw, kb, kw2, kb2 = jax.random.split(key, 6)
    x = jax.random.normal(kx, (N, Cin, T, V), dtype=jnp.float32)
    A = jax.random.normal(ka, (kernel_size, V, V), dtype=jnp.float32)
    W = jax.random.normal(kw, (Cout, Cin, 1, 1), dtype=jnp.float32) * 0.1
    b = jax.random.normal(kb, (Cout,), dtype=jnp.float32) * 0.1

    y_ref = _reference(x, A, W, b)

    # 1) f32 compute path (exercises the aggregate-first branch, Cin <= Cout): tight check,
    #    tolerance only covers MXU accumulation-order / dot-order reassociation in f32.
    y32 = jax.block_until_ready(
        conv_temporal_graphical(x, A, W, b, kernel_size, compute_dtype=jnp.float32))
    assert y32.shape == (N, Cout, T, V)
    assert jnp.allclose(y32, y_ref, atol=1e-3, rtol=1e-3), float(jnp.max(jnp.abs(y32 - y_ref)))

    # 2) Default bf16 compute (f32 MXU accumulation): looser tolerance covers bf16 rounding
    #    of x / A / W and of the intermediate between the two dots.
    ybf = jax.block_until_ready(conv_temporal_graphical(x, A, W, b, kernel_size))
    assert ybf.shape == (N, Cout, T, V)
    assert jnp.allclose(ybf, y_ref, atol=6e-2, rtol=6e-2), float(jnp.max(jnp.abs(ybf - y_ref)))

    # 3) C_in > C_out exercises the conv-first branch of the kernel.
    x2 = jax.random.normal(kx, (N, Cout, T, V), dtype=jnp.float32)          # 8 input channels
    W2 = jax.random.normal(kw2, (Cin, Cout, 1, 1), dtype=jnp.float32) * 0.1  # 4 output channels
    b2 = jax.random.normal(kb2, (Cin,), dtype=jnp.float32) * 0.1
    y2_ref = _reference(x2, A, W2, b2)
    y2 = jax.block_until_ready(
        conv_temporal_graphical(x2, A, W2, b2, kernel_size, compute_dtype=jnp.float32))
    assert y2.shape == (N, Cin, T, V)
    assert jnp.allclose(y2, y2_ref, atol=1e-3, rtol=1e-3), float(jnp.max(jnp.abs(y2 - y2_ref)))

    print("KERNEL_OK")
</pallas_src>

<mosaic_0001>
module attributes {stable_mosaic.version = 11 : i64} {
  func.func @_ctg_kernel(%arg0: i32, %arg1: i32, %arg2: memref<1x8x128xf32, #tpu.memory_space<vmem>>, %arg3: memref<1x128x128xf32, #tpu.memory_space<vmem>>, %arg4: memref<16x8xf32, #tpu.memory_space<vmem>>, %arg5: memref<16x128xf32, #tpu.memory_space<vmem>>, %arg6: memref<1x16x128xf32, #tpu.memory_space<vmem>>) attributes {dimension_semantics = [#tpu.dimension_semantics<parallel>, #tpu.dimension_semantics<parallel>], iteration_bounds = array<i64: 1, 1>, scalar_prefetch = 0 : i64, scratch_operands = 0 : i64, tpu.core_type = #tpu.core_type<tc>, window_params = [{transform_indices = @transform_0, window_bounds = array<i64: 1, 8, 128>}, {transform_indices = @transform_1, window_bounds = array<i64: 1, 128, 128>}, {pipeline_mode = #tpu.pipeline_mode<synchronous>, transform_indices = @transform_2, window_bounds = array<i64: 16, 8>}, {transform_indices = @transform_3, window_bounds = array<i64: 16, 128>}, {transform_indices = @transform_4, window_bounds = array<i64: 1, 16, 128>}]} {
    %c0 = arith.constant 0 : index
    %c0_0 = arith.constant 0 : index
    %c0_1 = arith.constant 0 : index
    %0 = vector.load %arg2[%c0, %c0_0, %c0_1] : memref<1x8x128xf32, #tpu.memory_space<vmem>>, vector<1x8x128xf32>
    %1 = vector.shape_cast %0 : vector<1x8x128xf32> to vector<8x128xf32>
    %c0_2 = arith.constant 0 : index
    %c0_3 = arith.constant 0 : index
    %c0_4 = arith.constant 0 : index
    %2 = vector.load %arg3[%c0_2, %c0_3, %c0_4] : memref<1x128x128xf32, #tpu.memory_space<vmem>>, vector<1x128x128xf32>
    %3 = vector.shape_cast %2 : vector<1x128x128xf32> to vector<128x128xf32>
    %c0_5 = arith.constant 0 : index
    %c0_6 = arith.constant 0 : index
    %4 = vector.load %arg4[%c0_5, %c0_6] : memref<16x8xf32, #tpu.memory_space<vmem>>, vector<16x8xf32>
    %cst = arith.constant dense<0.000000e+00> : vector<8x128xf32>
    %5 = tpu.matmul %1, %3, %cst {dimension_numbers = #tpu.dot_dimension_numbers<[1], [0], [0], [1], [0, 0, 1, 1], [], []>} : vector<8x128xf32>, vector<128x128xf32>, vector<8x128xf32> -> vector<8x128xf32>
    %cst_7 = arith.constant dense<0.000000e+00> : vector<16x128xf32>
    %6 = tpu.matmul %4, %5, %cst_7 {dimension_numbers = #tpu.dot_dimension_numbers<[1], [0], [0], [1], [0, 0, 1, 1], [], []>} : vector<16x8xf32>, vector<8x128xf32>, vector<16x128xf32> -> vector<16x128xf32>
    %c0_8 = arith.constant 0 : index
    %c0_9 = arith.constant 0 : index
    %7 = vector.load %arg5[%c0_8, %c0_9] : memref<16x128xf32, #tpu.memory_space<vmem>>, vector<16x128xf32>
    %8 = arith.addf %6, %7 : vector<16x128xf32>
    %c0_10 = arith.constant 0 : index
    %c0_11 = arith.constant 0 : index
    %c0_12 = arith.constant 0 : index
    %9 = vector.load %arg6[%c0_10, %c0_11, %c0_12] : memref<1x16x128xf32, #tpu.memory_space<vmem>>, vector<1x16x128xf32>
    %10 = vector.shape_cast %9 : vector<1x16x128xf32> to vector<16x128xf32>
    %11 = vector.shape_cast %8 : vector<16x128xf32> to vector<1x16x128xf32>
    tpu.vector_store %arg6[%c0_10, %c0_11, %c0_12], %11 {strides = array<i32>} : memref<1x16x128xf32, #tpu.memory_space<vmem>>, vector<1x16x128xf32>,
    return
  }
  func.func @transform_0(%arg0: i32, %arg1: i32) -> (i32, i32, i32) {
    %c0_i32 = arith.constant 0 : i32
    %c0_i32_0 = arith.constant 0 : i32
    return %arg1, %c0_i32, %arg0 : i32, i32, i32
  }
  func.func @transform_1(%arg0: i32, %arg1: i32) -> (i32, i32, i32) {
    %c0_i32 = arith.constant 0 : i32
    %c0_i32_0 = arith.constant 0 : i32
    %c0_i32_1 = arith.constant 0 : i32
    return %arg0, %c0_i32, %c0_i32_0 : i32, i32, i32
  }
  func.func @transform_2(%arg0: i32, %arg1: i32) -> (i32, i32) {
    %c0_i32 = arith.constant 0 : i32
    %c0_i32_0 = arith.constant 0 : i32
    %c0_i32_1 = arith.constant 0 : i32
    return %c0_i32, %c0_i32_0 : i32, i32
  }
  func.func @transform_3(%arg0: i32, %arg1: i32) -> (i32, i32) {
    %c0_i32 = arith.constant 0 : i32
    %c0_i32_0 = arith.constant 0 : i32
    return %c0_i32, %arg0 : i32, i32
  }
  func.func @transform_4(%arg0: i32, %arg1: i32) -> (i32, i32, i32) {
    %c0_i32 = arith.constant 0 : i32
    %c0_i32_0 = arith.constant 0 : i32
    return %arg1, %c0_i32, %arg0 : i32, i32, i32
  }
}

</mosaic_0001>

<bundles_post_ra>
// kernel: tpu_custom_call.1
= control target key start
LH: loop header
LB: loop body
LE: loop exit
PB: predicated region body
PF: predicated region fallthrough
CT: control target
= control target key end

     0   :  { %9 = vsyncpa [#allocation3], 0  ;;  %s394_s0 = inlined_call_operand.vmem [shape: f32[1,8,128], index: 0, kind: input, shape index: {}]   ;;  %s395_s1 = inlined_call_operand.hbm [shape: f32[1,128,128], index: 1, kind: input, shape index: {}]   ;;  %s396_s2 = inlined_call_operand.vmem [shape: f32[16,8], index: 2, kind: input, shape index: {}]   ;;  %s397_s3 = inlined_call_operand.vmem [shape: f32[16,128], index: 3, kind: input, shape index: {}]   ;;  %s398_s4 = inlined_call_operand.hbm [shape: f32[1,16,128], index: 4, kind: output, shape index: {}]  }
   0x1   :  { %10 = vsyncpa [#allocation4], 0  ;;  %s336_s15 = smov [#allocation2]  }
   0x2   :  { %s18_s16 = sshll.u32 %s336_s15, 4  ;;  %s19_s16 = int_to_ptr.vmem [resolvable:$true] %s18_s16 }
   0x3   :  { %s300_s17 = scalar_lea.vmem %s19_s16, 2048  ;;  %p305_p1 = scmp.lt.s32.totalorder %s19_s16, %s19_s16 }
   0x4   :  { %p301_p0 = scmp.ne.s32.totalorder %s19_s16, %s300_s17  ;;  %p306_p2 = scmp.lt.s32.totalorder %s300_s17, %s300_s17 }
   0x6   :  { %p307_p3 = por %p306_p2, %p305_p1 }
   0x8   :  { %p308_p4 = pnand %p307_p3, %p301_p0 }
   0xa   :  { %311 = shalt.err (!%p308_p4)
}
   0xb   :  { %s337_s18 = smov 128   ;;  %s338_s19 = smov 8  }
   0xc   :  { %24 = dma.hbm_to_vmem [thread:$0]  %s395_s1, 2048, %s19_s16, [#allocation3], %s337_s18, %s337_s18, %s338_s19  }
   0xd   :  { %332 = dma.done.wait [#allocation3], 2048  }
   0xe   :  { %333 = vsyncadd [#allocation3], 4294965248  ;;  %v339_v0 = vmov 0.0   ;;  %vm340_vm0 = vmmov 0   ;;  %v48_v1 = vld [vmem:[#allocation2 + $0x78] sm:$0xff]  ;;  %v47_v2 = vld [vmem:[#allocation2 + $0x70] sm:$0xff] }
   0xf   :  { %246 = vmatprep.subr.mxu0 %v339_v0  ;;  %278 = vmatprep.mubr.msk.f32.mxu0 %vm340_vm0, %v339_v0  ;;  %v46_v3 = vld [vmem:[#allocation2 + $0x68] sm:$0xff]  ;;  %v45_v4 = vld [vmem:[#allocation2 + $0x60] sm:$0xff]  ;;  %v44_v5 = vld [vmem:[#allocation2 + $0x58] sm:$0xff]  ;;  %vm123_vm1 = vcmask 64512   ;;  %s341_s30 = smov [#allocation5]  }
  0x10   :  { %247 = vmatpush3.msra.mxu0 %v48_v1  ;;  %v43_v6 = vld [vmem:[#allocation2 + $0x50] sm:$0xff]  ;;  %v42_v7 = vld [vmem:[#allocation2 + $0x48] sm:$0xff]  ;;  %v41_v8 = vld [vmem:[#allocation2 + $0x40] sm:$0xff]  ;;  %s212_s5 = sshll.u32 %s341_s30, 4  ;;  %s213_s5 = int_to_ptr.vmem [resolvable:$true] %s212_s5 }
  0x11   :  { %248 = vmatprep.subr.mxu0 %v339_v0  ;;  %v40_v9 = vld [vmem:[#allocation2 + $0x38] sm:$0xff]  ;;  %v39_v10 = vld [vmem:[#allocation2 + $0x30] sm:$0xff]  ;;  %v38_v11 = vld [vmem:[#allocation2 + $0x28] sm:$0xff]  ;;  %p317_p6 = scmp.lt.s32.totalorder %s213_s5, %s213_s5 }
  0x12   :  { %249 = vmatpush3.msra.mxu0 %v47_v2  ;;  %v37_v12 = vld [vmem:[#allocation2 + $0x20] sm:$0xff]  ;;  %v36_v13 = vld [vmem:[#allocation2 + $0x18] sm:$0xff]  ;;  %v35_v14 = vld [vmem:[#allocation2 + $0x10] sm:$0xff] }
  0x13   :  { %250 = vmatprep.subr.mxu0 %v339_v0  ;;  %v34_v15 = vld [vmem:[#allocation2 + $0x8] sm:$0xff]  ;;  %v33_v16 = vld [vmem:[#allocation2] sm:$0xff] }
  0x14   :  { %251 = vmatpush3.msra.mxu0 %v46_v3  ;;  %v32_v17 = vld [vmem:[%s394_s0] sm:$0xff]  ;;  %v50_v20 = vld [vmem:[%s396_s2 + $0x8] sm:$0xff] }
  0x15   :  { %252 = vmatprep.subr.mxu0 %v339_v0  ;;  %v49_v18 = vld [vmem:[%s396_s2] sm:$0xff]  ;;  %v122_v22 = vld [vmem:[%s397_s3 + $0x8] sm:$0xff]  ;;  %s312_s2 = scalar_lea.vmem %s213_s5, 256 }
  0x16   :  { %253 = vmatpush3.msra.mxu0 %v45_v4  ;;  %283 = vmatprep.mubr.msk.f32.mxu1 %vm123_vm1, %v49_v18  ;;  %v121_v24 = vld [vmem:[%s397_s3] sm:$0xff]  ;;  %p313_p5 = scmp.ne.s32.totalorder %s213_s5, %s312_s2  ;;  %p318_p7 = scmp.lt.s32.totalorder %s312_s2, %s312_s2 }
  0x17   :  { %254 = vmatprep.subr.mxu0 %v339_v0 }
  0x18   :  { %255 = vmatpush3.msra.mxu0 %v44_v5  ;;  %p319_p8 = por %p318_p7, %p317_p6 }
  0x19   :  { %256 = vmatprep.subr.mxu0 %v339_v0 }
  0x1a   :  { %257 = vmatpush3.msra.mxu0 %v43_v6  ;;  %p320_p9 = pnand %p319_p8, %p313_p5 }
  0x1b   :  { %258 = vmatprep.subr.mxu0 %v339_v0 }
  0x1c   :  { %259 = vmatpush3.msra.mxu0 %v42_v7 }
  0x1d   :  { %260 = vmatprep.subr.mxu0 %v339_v0 }
  0x1e   :  { %261 = vmatpush3.msra.mxu0 %v41_v8 }
  0x1f   :  { %262 = vmatprep.subr.mxu0 %v339_v0 }
  0x20   :  { %263 = vmatpush3.msra.mxu0 %v40_v9 }
  0x21   :  { %264 = vmatprep.subr.mxu0 %v339_v0 }
  0x22   :  { %265 = vmatpush3.msra.mxu0 %v39_v10 }
  0x23   :  { %266 = vmatprep.subr.mxu0 %v339_v0 }
  0x24   :  { %267 = vmatpush3.msra.mxu0 %v38_v11 }
  0x25   :  { %268 = vmatprep.subr.mxu0 %v339_v0 }
  0x26   :  { %269 = vmatpush3.msra.mxu0 %v37_v12 }
  0x27   :  { %270 = vmatprep.subr.mxu0 %v339_v0 }
  0x28   :  { %271 = vmatpush3.msra.mxu0 %v36_v13 }
  0x29   :  { %272 = vmatprep.subr.mxu0 %v339_v0 }
  0x2a   :  { %273 = vmatpush3.msra.mxu0 %v35_v14 }
  0x2b   :  { %274 = vmatprep.subr.mxu0 %v339_v0 }
  0x2c   :  { %275 = vmatpush3.msra.mxu0 %v34_v15 }
  0x2d   :  { %276 = vmatprep.subr.mxu0 %v339_v0 }
  0x2e   :  { %277 = vmatpush3.msra.mxu0 %v33_v16 }
  0x2f   :  { %279 = vmatmul.mubr.f32.vlgmr.msra.gmra.mxu0 %v32_v17 }
  0xef   :  { %v117_v19 = vpop.f32.mrf.mxu0 }
  0xf0   :  { %281 = vmatprep.subr.mxu1 %v117_v19 }
  0xf1   :  { %v280_v21 = vpop.f32.mrf.mxu0  ;;  %282 = vmatpush3.msra.mxu1 %v117_v19 }
  0xf2   :  { %284 = vmatmul.mubr.msk.f32.vlgmr.msra.gmra.mxu1 %vm123_vm1, %v50_v20 }
 0x1b2   :  { %v285_v23 = vpop.f32.mrf.mxu1 }
 0x1b3   :  { %v202_v25 = vadd.f32 %v285_v23, %v122_v22 }
 0x1b4   :  { %v196_v26 = vpop.f32.mrf.mxu1 }
 0x1b5   :  { %206 = vst [vmem:[#allocation5 + $0x8] sm:$0xff] %v202_v25  ;;  %v197_v27 = vadd.f32 %v196_v26, %v121_v24 }
 0x1b7   :  { %205 = vst [vmem:[#allocation5] sm:$0xff] %v197_v27 }
 0x1b8   :  { %323 = shalt.err (!%p320_p9)
}
 0x1b9   :  { %218 = dma.vmem_to_hbm [thread:$0]  %s213_s5, 256, %s398_s4, [#allocation4], %s337_s18, %s337_s18, %s338_s19  }
 0x1ba   :  { %334 = dma.done.wait [#allocation4], 256  }
 0x1bb   :  { %335 = vsyncadd [#allocation4], 4294967040 }
 0x1bc   :  { %222 = vsyncpa [#allocation3], 1 }
 0x1bd   :  { %223 = vsyncpa [#allocation4], 1 }

</bundles_post_ra>
